<compile_context>
chip_gen: v7x
topology: tpu7x:2x2x1
jax: 0.10.0
libtpu: 0.0.40
codegen_flags: <defaults>
</compile_context>

<pallas_src>
import jax
import jax.numpy as jnp
from jax import lax
from jax.experimental import pallas as pl
from jax.experimental.pallas import tpu as pltpu


# Contract the last axis of `a` against the last axis of `b` (a @ b.T) so the PyTorch
# (out, in) layout of w1/w3 is consumed directly with full-row contiguous DMAs.
_DN_NT = (((1,), (1,)), ((), ()))


def _make_mlp_kernel(ti, slice_bias, acc_in_out):
    """Build the kernel body with trace-time constants baked in.

    ti         : inter-dim tile width (used for in-kernel bias slicing).
    slice_bias : True when b1/b3 are full (1, inter) resident blocks and the per-step
                 (1, ti) slice is taken in-kernel (ti is a 128-multiple in that case).
    acc_in_out : True when the output dtype is f32 so partial sums accumulate directly
                 into o_ref (no f32 VMEM scratch).
    """

    def kernel(x_ref, w1_ref, b1_ref, w3_ref, b3_ref, w2t_ref, b2_ref,
               o_ref, *scratch):
        j = pl.program_id(1)
        nj = pl.num_programs(1)

        if slice_bias:
            off = pl.multiple_of(j * ti, 128)
            b1 = b1_ref[:, pl.ds(off, ti)]
            b3 = b3_ref[:, pl.ds(off, ti)]
        else:
            b1 = b1_ref[...]
            b3 = b3_ref[...]

        x = x_ref[...]
        # h1/h3: (tm, ti) in f32. w1/w3 keep the PyTorch (inter, dim) layout so their
        # (ti, dim) tiles are contiguous row DMAs; the MXU contracts the trailing axes.
        h1 = lax.dot_general(x, w1_ref[...], _DN_NT,
                             preferred_element_type=jnp.float32) + b1
        h3 = lax.dot_general(x, w3_ref[...], _DN_NT,
                             preferred_element_type=jnp.float32) + b3
        # silu(h1) * h3 in f32 (sigmoid rides the EUP slot under the MXU work).
        g = (h1 * jax.nn.sigmoid(h1)) * h3

        # Second matmul in standard (M,K)x(K,N) orientation: w2 is pre-transposed to
        # (inter, dim), so its tile is contiguous and no RHS transpose is needed.
        partial = jnp.dot(g.astype(w2t_ref.dtype), w2t_ref[...],
                          preferred_element_type=jnp.float32)

        if acc_in_out:
            @pl.when(j == 0)
            def _():
                o_ref[...] = partial

            @pl.when(j > 0)
            def _():
                o_ref[...] += partial

            @pl.when(j == nj - 1)
            def _():
                o_ref[...] += b2_ref[...]     # b2 added exactly once
        else:
            acc_ref = scratch[0]

            @pl.when(j == 0)
            def _():
                acc_ref[...] = partial

            @pl.when(j > 0)
            def _():
                acc_ref[...] += partial

            @pl.when(j == nj - 1)
            def _():
                o_ref[...] = (acc_ref[...] + b2_ref[...]).astype(o_ref.dtype)

    return kernel


def _physical_vmem_bytes():
    try:
        info = pltpu.get_tpu_info()
        v = getattr(info, "vmem_capacity_bytes", None)
        if v:
            return int(v)
    except Exception:
        pass
    return 64 << 20           # conservative (v7x-sized) fallback


def _default_tiles(phys_vmem, itemsize):
    """Generation / dtype-aware (tm, ti) defaults."""
    if phys_vmem >= (100 << 20):               # v5e / v6e: 128 MiB VMEM
        return (512, 512) if itemsize <= 2 else (512, 256)
    # v7x-class: 64 MiB VMEM
    return (512, 256) if itemsize <= 2 else (256, 256)


def _choose_inter_tile(inter, preferred):
    """Largest 128-multiple <= preferred that divides inter, else the whole axis."""
    if inter <= preferred:
        return inter
    t = (preferred // 128) * 128
    while t >= 128:
        if inter % t == 0:
            return t
        t -= 128
    return inter


def _round_up(x, m):
    return ((x + m - 1) // m) * m


def mlp_pallas(x, w1, b1, w2, b2, w3, b3, *, tm=None, ti=None):
    """SwiGLU MLP forward.  x: (..., dim); weights in PyTorch nn.Linear (out, in)
    layout: w1, w3: (inter, dim); w2: (dim, inter).  Dropout = identity (inference)."""
    orig_shape = x.shape
    inter, dim = w1.shape
    assert w3.shape == (inter, dim) and w2.shape == (dim, inter)

    x = jnp.asarray(x)
    itemsize = jnp.dtype(x.dtype).itemsize
    out_dtype = x.dtype
    acc_in_out = (out_dtype == jnp.float32)

    phys_vmem = _physical_vmem_bytes()
    tm_def, ti_def = _default_tiles(phys_vmem, itemsize)
    tm = tm_def if tm is None else tm
    ti = ti_def if ti is None else ti

    x2 = x.reshape(-1, dim)
    n_tokens = x2.shape[0]

    # Token tile: multiple of 8; ragged token counts are zero-padded so the grid never
    # degenerates to one enormous block.
    tm = min(tm, _round_up(n_tokens, 8))
    tm = _round_up(tm, 8)
    n_pad = (-n_tokens) % tm
    if n_pad:
        x2 = jnp.pad(x2, ((0, n_pad), (0, 0)))
    ntp = n_tokens + n_pad

    ti = _choose_inter_tile(inter, ti)
    grid = (ntp // tm, inter // ti)
    slice_bias = grid[1] > 1          # ti is a 128-multiple whenever we slice

    # w2 pre-transposed once to (inter, dim): contiguous (ti, dim) weight DMAs and a
    # standard-orientation second matmul. (Ideally callers keep it stored this way.)
    w1 = jnp.asarray(w1)
    w3 = jnp.asarray(w3)
    w2t = jnp.asarray(w2).T

    # Biases stay f32 (tiny, exact accumulation); b1/b3/b2 are resident full blocks.
    b1r = jnp.asarray(b1, jnp.float32).reshape(1, inter)
    b3r = jnp.asarray(b3, jnp.float32).reshape(1, inter)
    b2r = jnp.asarray(b2, jnp.float32).reshape(1, dim)

    # Honest VMEM budget: double-buffered tiles + accumulator + f32 elementwise
    # temporaries (h1/h3/sigmoid/g) + Mosaic internal-scratch headroom.
    vmem_est = (
        2 * tm * dim * itemsize                       # x tile (double buffered)
        + 2 * 3 * ti * dim * itemsize                 # w1 / w3 / w2t tiles
        + 2 * (2 * inter + dim) * 4                   # resident biases
        + 2 * tm * dim * itemsize                     # output tile
        + (0 if acc_in_out else tm * dim * 4)         # f32 accumulator scratch
        + 4 * tm * ti * 4                             # f32 temporaries
        + (2 << 20)                                   # compiler scratch headroom
    )
    compiler_kwargs = dict(dimension_semantics=("parallel", "arbitrary"))
    if vmem_est > (16 << 20):
        # Never request more than ~85% of this generation's physical VMEM
        # (64 MiB on v7x, 128 MiB on v5e/v6e).
        vmem_cap = int(0.85 * phys_vmem)
        compiler_kwargs["vmem_limit_bytes"] = min(int(1.2 * vmem_est), vmem_cap)

    # Weights are re-streamed once per token block: charge them grid[0] times.
    weight_bytes = (w1.size + w3.size + w2t.size) * itemsize
    bytes_accessed = (x2.size * itemsize + ntp * dim * itemsize
                      + weight_bytes * grid[0]
                      + (2 * inter + dim) * 4)
    flops = 2 * ntp * dim * inter * 3

    kernel = _make_mlp_kernel(ti, slice_bias, acc_in_out)

    out = pl.pallas_call(
        kernel,
        out_shape=jax.ShapeDtypeStruct((ntp, dim), out_dtype),
        grid_spec=pltpu.PrefetchScalarGridSpec(
            num_scalar_prefetch=0,
            grid=grid,
            in_specs=[
                pl.BlockSpec((tm, dim), lambda i, j: (i, 0)),     # x
                pl.BlockSpec((ti, dim), lambda i, j: (j, 0)),     # w1  (inter, dim)
                pl.BlockSpec((1, inter), lambda i, j: (0, 0)),    # b1  (resident)
                pl.BlockSpec((ti, dim), lambda i, j: (j, 0)),     # w3  (inter, dim)
                pl.BlockSpec((1, inter), lambda i, j: (0, 0)),    # b3  (resident)
                pl.BlockSpec((ti, dim), lambda i, j: (j, 0)),     # w2t (inter, dim)
                pl.BlockSpec((1, dim), lambda i, j: (0, 0)),      # b2  (resident)
            ],
            out_specs=pl.BlockSpec((tm, dim), lambda i, j: (i, 0)),
            scratch_shapes=([] if acc_in_out
                            else [pltpu.VMEM((tm, dim), jnp.float32)]),
        ),
        compiler_params=pltpu.CompilerParams(**compiler_kwargs),
        cost_estimate=pl.CostEstimate(
            flops=flops,
            transcendentals=ntp * inter,
            bytes_accessed=bytes_accessed),
    )(x2, w1, b1r, w3, b3r, w2t, b2r)

    if n_pad:
        out = out[:n_tokens]
    return out.reshape(orig_shape)


def _linear_init(key, out_features, in_features, dtype=jnp.float32):
    """Deterministic nn.Linear-style init: U(-1/sqrt(in), 1/sqrt(in))."""
    kw, kb = jax.random.split(key)
    bound = 1.0 / (in_features ** 0.5)
    w = jax.random.uniform(kw, (out_features, in_features), dtype,
                           minval=-bound, maxval=bound)
    b = jax.random.uniform(kb, (out_features,), dtype,
                           minval=-bound, maxval=bound)
    return w, b


def mlp_reference(x, w1, b1, w2, b2, w3, b3):
    x1 = x @ w1.T + b1
    x3 = x @ w3.T + b3
    g = (x1 * jax.nn.sigmoid(x1)) * x3
    return g @ w2.T + b2


if __name__ == "__main__":
    # --- Test 1: small shapes consistent with the module (f32, accumulate-in-output) ---
    batch, seq, dim, inter_dim = 2, 8, 32, 64
    key = jax.random.PRNGKey(0)
    kx, k1, k2, k3 = jax.random.split(key, 4)

    x = jax.random.normal(kx, (batch, seq, dim), jnp.float32)
    w1, b1 = _linear_init(k1, inter_dim, dim)
    w2, b2 = _linear_init(k2, dim, inter_dim)
    w3, b3 = _linear_init(k3, inter_dim, dim)

    out = jax.block_until_ready(mlp_pallas(x, w1, b1, w2, b2, w3, b3))
    ref = mlp_reference(x, w1, b1, w2, b2, w3, b3)
    assert out.shape == ref.shape == (batch, seq, dim)
    assert jnp.allclose(out, ref, atol=1e-5, rtol=1e-5), "f32 mismatch vs reference"

    # --- Test 2: multi-block grid, ragged token count (padding path), bf16 streaming ---
    batch2, seq2, dim2, inter2 = 2, 100, 256, 512     # 200 tokens -> padded to 256
    kx2, k12, k22, k32 = jax.random.split(jax.random.PRNGKey(1), 4)
    xb = jax.random.normal(kx2, (batch2, seq2, dim2), jnp.float32).astype(jnp.bfloat16)
    w1b, b1b = _linear_init(k12, inter2, dim2)
    w2b, b2b = _linear_init(k22, dim2, inter2)
    w3b, b3b = _linear_init(k32, inter2, dim2)
    w1b, w2b, w3b = (w.astype(jnp.bfloat16) for w in (w1b, w2b, w3b))

    outb = jax.block_until_ready(
        mlp_pallas(xb, w1b, b1b, w2b, b2b, w3b, b3b, tm=128, ti=256))
    refb = mlp_reference(xb.astype(jnp.float32),
                         w1b.astype(jnp.float32), b1b,
                         w2b.astype(jnp.float32), b2b,
                         w3b.astype(jnp.float32), b3b)
    assert outb.shape == refb.shape == (batch2, seq2, dim2)
    # NOTE: g is downcast to bf16 before the second matmul, so ~1e-2-level deviation
    # from the full-f32 reference is expected.
    assert jnp.allclose(outb.astype(jnp.float32), refb, atol=2e-2, rtol=2e-2), \
        "bf16 mismatch vs reference"

    print("KERNEL_OK")
</pallas_src>

<mosaic_0001>
module attributes {stable_mosaic.version = 11 : i64} {
  func.func @kernel(%arg0: i32, %arg1: i32, %arg2: memref<16x32xf32, #tpu.memory_space<vmem>>, %arg3: memref<64x32xf32, #tpu.memory_space<vmem>>, %arg4: memref<1x64xf32, #tpu.memory_space<vmem>>, %arg5: memref<64x32xf32, #tpu.memory_space<vmem>>, %arg6: memref<1x64xf32, #tpu.memory_space<vmem>>, %arg7: memref<64x32xf32, #tpu.memory_space<vmem>>, %arg8: memref<1x32xf32, #tpu.memory_space<vmem>>, %arg9: memref<16x32xf32, #tpu.memory_space<vmem>>) attributes {dimension_semantics = [#tpu.dimension_semantics<parallel>, #tpu.dimension_semantics<arbitrary>], iteration_bounds = array<i64: 1, 1>, scalar_prefetch = 0 : i64, scratch_operands = 0 : i64, tpu.core_type = #tpu.core_type<tc>, window_params = [{transform_indices = @transform_0, window_bounds = array<i64: 16, 32>}, {transform_indices = @transform_1, window_bounds = array<i64: 64, 32>}, {pipeline_mode = #tpu.pipeline_mode<synchronous>, transform_indices = @transform_2, window_bounds = array<i64: 1, 64>}, {transform_indices = @transform_3, window_bounds = array<i64: 64, 32>}, {pipeline_mode = #tpu.pipeline_mode<synchronous>, transform_indices = @transform_4, window_bounds = array<i64: 1, 64>}, {transform_indices = @transform_5, window_bounds = array<i64: 64, 32>}, {pipeline_mode = #tpu.pipeline_mode<synchronous>, transform_indices = @transform_6, window_bounds = array<i64: 1, 32>}, {transform_indices = @transform_7, window_bounds = array<i64: 16, 32>}]} {
    %c0 = arith.constant 0 : index
    %c0_0 = arith.constant 0 : index
    %0 = vector.load %arg4[%c0, %c0_0] : memref<1x64xf32, #tpu.memory_space<vmem>>, vector<1x64xf32>
    %c0_1 = arith.constant 0 : index
    %c0_2 = arith.constant 0 : index
    %1 = vector.load %arg6[%c0_1, %c0_2] : memref<1x64xf32, #tpu.memory_space<vmem>>, vector<1x64xf32>
    %c0_3 = arith.constant 0 : index
    %c0_4 = arith.constant 0 : index
    %2 = vector.load %arg2[%c0_3, %c0_4] : memref<16x32xf32, #tpu.memory_space<vmem>>, vector<16x32xf32>
    %c0_5 = arith.constant 0 : index
    %c0_6 = arith.constant 0 : index
    %3 = vector.load %arg3[%c0_5, %c0_6] : memref<64x32xf32, #tpu.memory_space<vmem>>, vector<64x32xf32>
    %cst = arith.constant dense<0.000000e+00> : vector<16x64xf32>
    %4 = tpu.matmul %2, %3, %cst {dimension_numbers = #tpu.dot_dimension_numbers<[1], [1], [0], [0], [0, 0, 1, 0], [], []>} : vector<16x32xf32>, vector<64x32xf32>, vector<16x64xf32> -> vector<16x64xf32>
    %5 = vector.broadcast %0 : vector<1x64xf32> to vector<16x64xf32>
    %6 = arith.addf %4, %5 : vector<16x64xf32>
    %c0_7 = arith.constant 0 : index
    %c0_8 = arith.constant 0 : index
    %7 = vector.load %arg5[%c0_7, %c0_8] : memref<64x32xf32, #tpu.memory_space<vmem>>, vector<64x32xf32>
    %cst_9 = arith.constant dense<0.000000e+00> : vector<16x64xf32>
    %8 = tpu.matmul %2, %7, %cst_9 {dimension_numbers = #tpu.dot_dimension_numbers<[1], [1], [0], [0], [0, 0, 1, 0], [], []>} : vector<16x32xf32>, vector<64x32xf32>, vector<16x64xf32> -> vector<16x64xf32>
    %9 = vector.broadcast %1 : vector<1x64xf32> to vector<16x64xf32>
    %10 = arith.addf %8, %9 : vector<16x64xf32>
    %11 = arith.negf %6 : vector<16x64xf32>
    %12 = math.exp %11 : vector<16x64xf32>
    %cst_10 = arith.constant 1.000000e+00 : f32
    %13 = vector.broadcast %cst_10 : f32 to vector<16x64xf32>
    %14 = arith.addf %13, %12 : vector<16x64xf32>
    %15 = arith.divf %13, %14 : vector<16x64xf32>
    %16 = arith.mulf %6, %15 : vector<16x64xf32>
    %17 = arith.mulf %16, %10 : vector<16x64xf32>
    %c0_11 = arith.constant 0 : index
    %c0_12 = arith.constant 0 : index
    %18 = vector.load %arg7[%c0_11, %c0_12] : memref<64x32xf32, #tpu.memory_space<vmem>>, vector<64x32xf32>
    %cst_13 = arith.constant dense<0.000000e+00> : vector<16x32xf32>
    %19 = tpu.matmul %17, %18, %cst_13 {dimension_numbers = #tpu.dot_dimension_numbers<[1], [0], [0], [1], [0, 0, 1, 1], [], []>} : vector<16x64xf32>, vector<64x32xf32>, vector<16x32xf32> -> vector<16x32xf32>
    %c0_i32 = arith.constant 0 : i32
    %20 = arith.cmpi eq, %arg1, %c0_i32 : i32
    %21 = arith.extui %20 : i1 to i32
    %c0_i32_14 = arith.constant 0 : i32
    %22 = arith.cmpi ne, %21, %c0_i32_14 : i32
    scf.if %22 {
      %c0_19 = arith.constant 0 : index
      %c0_20 = arith.constant 0 : index
      %29 = vector.load %arg9[%c0_19, %c0_20] : memref<16x32xf32, #tpu.memory_space<vmem>>, vector<16x32xf32>
      tpu.vector_store %arg9[%c0_19, %c0_20], %19 {strides = array<i32>} : memref<16x32xf32, #tpu.memory_space<vmem>>, vector<16x32xf32>,
    } else {
    }
    %c0_i32_15 = arith.constant 0 : i32
    %23 = arith.cmpi sgt, %arg1, %c0_i32_15 : i32
    %24 = arith.extui %23 : i1 to i32
    %c0_i32_16 = arith.constant 0 : i32
    %25 = arith.cmpi ne, %24, %c0_i32_16 : i32
    scf.if %25 {
      %c0_19 = arith.constant 0 : index
      %c0_20 = arith.constant 0 : index
      %29 = vector.load %arg9[%c0_19, %c0_20] : memref<16x32xf32, #tpu.memory_space<vmem>>, vector<16x32xf32>
      %30 = arith.addf %29, %19 : vector<16x32xf32>
      %c0_21 = arith.constant 0 : index
      %c0_22 = arith.constant 0 : index
      %31 = vector.load %arg9[%c0_21, %c0_22] : memref<16x32xf32, #tpu.memory_space<vmem>>, vector<16x32xf32>
      tpu.vector_store %arg9[%c0_21, %c0_22], %30 {strides = array<i32>} : memref<16x32xf32, #tpu.memory_space<vmem>>, vector<16x32xf32>,
    } else {
    }
    %c0_i32_17 = arith.constant 0 : i32
    %26 = arith.cmpi eq, %arg1, %c0_i32_17 : i32
    %27 = arith.extui %26 : i1 to i32
    %c0_i32_18 = arith.constant 0 : i32
    %28 = arith.cmpi ne, %27, %c0_i32_18 : i32
    scf.if %28 {
      %c0_19 = arith.constant 0 : index
      %c0_20 = arith.constant 0 : index
      %29 = vector.load %arg9[%c0_19, %c0_20] : memref<16x32xf32, #tpu.memory_space<vmem>>, vector<16x32xf32>
      %c0_21 = arith.constant 0 : index
      %c0_22 = arith.constant 0 : index
      %30 = vector.load %arg8[%c0_21, %c0_22] : memref<1x32xf32, #tpu.memory_space<vmem>>, vector<1x32xf32>
      %31 = vector.broadcast %30 : vector<1x32xf32> to vector<16x32xf32>
      %32 = arith.addf %29, %31 : vector<16x32xf32>
      %c0_23 = arith.constant 0 : index
      %c0_24 = arith.constant 0 : index
      %33 = vector.load %arg9[%c0_23, %c0_24] : memref<16x32xf32, #tpu.memory_space<vmem>>, vector<16x32xf32>
      tpu.vector_store %arg9[%c0_23, %c0_24], %32 {strides = array<i32>} : memref<16x32xf32, #tpu.memory_space<vmem>>, vector<16x32xf32>,
    } else {
    }
    return
  }
  func.func @transform_0(%arg0: i32, %arg1: i32) -> (i32, i32) {
    %c0_i32 = arith.constant 0 : i32
    %c0_i32_0 = arith.constant 0 : i32
    return %arg0, %c0_i32 : i32, i32
  }
  func.func @transform_1(%arg0: i32, %arg1: i32) -> (i32, i32) {
    %c0_i32 = arith.constant 0 : i32
    %c0_i32_0 = arith.constant 0 : i32
    return %arg1, %c0_i32 : i32, i32
  }
  func.func @transform_2(%arg0: i32, %arg1: i32) -> (i32, i32) {
    %c0_i32 = arith.constant 0 : i32
    %c0_i32_0 = arith.constant 0 : i32
    %c0_i32_1 = arith.constant 0 : i32
    return %c0_i32, %c0_i32_0 : i32, i32
  }
  func.func @transform_3(%arg0: i32, %arg1: i32) -> (i32, i32) {
    %c0_i32 = arith.constant 0 : i32
    %c0_i32_0 = arith.constant 0 : i32
    return %arg1, %c0_i32 : i32, i32
  }
  func.func @transform_4(%arg0: i32, %arg1: i32) -> (i32, i32) {
    %c0_i32 = arith.constant 0 : i32
    %c0_i32_0 = arith.constant 0 : i32
    %c0_i32_1 = arith.constant 0 : i32
    return %c0_i32, %c0_i32_0 : i32, i32
  }
  func.func @transform_5(%arg0: i32, %arg1: i32) -> (i32, i32) {
    %c0_i32 = arith.constant 0 : i32
    %c0_i32_0 = arith.constant 0 : i32
    return %arg1, %c0_i32 : i32, i32
  }
  func.func @transform_6(%arg0: i32, %arg1: i32) -> (i32, i32) {
    %c0_i32 = arith.constant 0 : i32
    %c0_i32_0 = arith.constant 0 : i32
    %c0_i32_1 = arith.constant 0 : i32
    return %c0_i32, %c0_i32_0 : i32, i32
  }
  func.func @transform_7(%arg0: i32, %arg1: i32) -> (i32, i32) {
    %c0_i32 = arith.constant 0 : i32
    %c0_i32_0 = arith.constant 0 : i32
    return %arg0, %c0_i32 : i32, i32
  }
}

</mosaic_0001>

<bundles_post_ra>
// kernel: tpu_custom_call.1
= control target key start
LH: loop header
LB: loop body
LE: loop exit
PB: predicated region body
PF: predicated region fallthrough
CT: control target
= control target key end

     0   :  { %vm45_vm0 = vcmask 261120   ;;  %s819_s0 = inlined_call_operand.vmem [shape: f32[16,32], index: 0, kind: input, shape index: {}]   ;;  %s820_s1 = inlined_call_operand.vmem [shape: f32[64,32], index: 1, kind: input, shape index: {}]   ;;  %s821_s2 = inlined_call_operand.vmem [shape: f32[1,64], index: 2, kind: input, shape index: {}]   ;;  %s822_s3 = inlined_call_operand.vmem [shape: f32[64,32], index: 3, kind: input, shape index: {}]   ;;  %s823_s4 = inlined_call_operand.vmem [shape: f32[1,64], index: 4, kind: input, shape index: {}]   ;;  %s824_s5 = inlined_call_operand.vmem [shape: f32[64,32], index: 5, kind: input, shape index: {}]   ;;  %s825_s6 = inlined_call_operand.vmem [shape: f32[1,32], index: 6, kind: input, shape index: {}]   ;;  %s826_s7 = inlined_call_operand.hbm [shape: f32[16,32], index: 7, kind: output, shape index: {}]  }
   0x1   :  { %v31_v0 = vld [vmem:[%s820_s1] sm:$0xff]  ;;  %v32_v1 = vld [vmem:[%s820_s1 + $0x8] sm:$0xff]  ;;  %v33_v2 = vld [vmem:[%s820_s1 + $0x10] sm:$0xff] }
   0x2   :  { %v532_v3 = vpack.c.bf16 %v32_v1, %v31_v0  ;;  %vm685_vm1 = vmpackc.low %vm45_vm0, %vm45_vm0  ;;  %v34_v5 = vld [vmem:[%s820_s1 + $0x18] sm:$0xff]  ;;  %v151_v7 = vld [vmem:[%s822_s3] sm:$0xff] }
   0x3   :  { %v538_v6 = vpack.c.bf16 %v34_v5, %v33_v2  ;;  %v152_v8 = vld [vmem:[%s822_s3 + $0x8] sm:$0xff]  ;;  %v29_v9 = vld [vmem:[%s819_s0] sm:$0xff]  ;;  %v153_v11 = vld [vmem:[%s822_s3 + $0x10] sm:$0xff] }
   0x4   :  { %534 = vmatprep.subr.msk.bf16.mxu0 %vm685_vm1, %v532_v3  ;;  %v556_v10 = vpack.c.bf16 %v152_v8, %v151_v7  ;;  %491 = vmatprep.mubr.msk.f32.mxu0 %vm45_vm0, %v29_v9  ;;  %v154_v12 = vld [vmem:[%s822_s3 + $0x18] sm:$0xff]  ;;  %v35_v14 = vld [vmem:[%s820_s1 + $0x20] sm:$0xff]  ;;  %v36_v15 = vld [vmem:[%s820_s1 + $0x28] sm:$0xff] }
   0x5   :  { %537 = vmatpush3.bf16.xpose.msk.msra.mxu0 %vm685_vm1, %v532_v3  ;;  %v562_v13 = vpack.c.bf16 %v154_v12, %v153_v11  ;;  %510 = vmatprep.mubr.msk.f32.mxu1 %vm45_vm0, %v29_v9 }
   0x6   :  { %540 = vmatprep.subr.msk.bf16.mxu0 %vm685_vm1, %v538_v6  ;;  %558 = vmatprep.subr.msk.bf16.mxu1 %vm685_vm1, %v556_v10 }
   0x7   :  { %12 = vsyncpa [#allocation3], 0  ;;  %561 = vmatpush3.bf16.xpose.msk.msra.mxu1 %vm685_vm1, %v556_v10  ;;  %v544_v16 = vpack.c.bf16 %v36_v15, %v35_v14  ;;  %v155_v17 = vld [vmem:[%s822_s3 + $0x20] sm:$0xff]  ;;  %v156_v18 = vld [vmem:[%s822_s3 + $0x28] sm:$0xff]  ;;  %vm288_vm2 = vcmask 523264  }
   0x8   :  { %564 = vmatprep.subr.msk.bf16.mxu1 %vm685_vm1, %v562_v13  ;;  %v568_v19 = vpack.c.bf16 %v156_v18, %v155_v17  ;;  %v37_v20 = vld [vmem:[%s820_s1 + $0x30] sm:$0xff]  ;;  %v38_v21 = vld [vmem:[%s820_s1 + $0x38] sm:$0xff]  ;;  %v30_v26 = vld [vmem:[%s819_s0 + $0x8] sm:$0xff] }
   0x9   :  { %v550_v22 = vpack.c.bf16 %v38_v21, %v37_v20  ;;  %v157_v23 = vld [vmem:[%s822_s3 + $0x30] sm:$0xff]  ;;  %v158_v24 = vld [vmem:[%s822_s3 + $0x38] sm:$0xff]  ;;  %v280_v27 = vld [vmem:[%s824_s5] sm:$0xff] }
   0xa   :  { %v574_v25 = vpack.c.bf16 %v158_v24, %v157_v23  ;;  %v281_v28 = vld [vmem:[%s824_s5 + $0x8] sm:$0xff]  ;;  %v282_v30 = vld [vmem:[%s824_s5 + $0x10] sm:$0xff]  ;;  %v283_v31 = vld [vmem:[%s824_s5 + $0x18] sm:$0xff] }
   0xb   :  { %v580_v29 = vpack.c.bf16 %v281_v28, %v280_v27  ;;  %v584_v32 = vpack.c.bf16 %v283_v31, %v282_v30  ;;  %v284_v33 = vld [vmem:[%s824_s5 + $0x20] sm:$0xff]  ;;  %v285_v34 = vld [vmem:[%s824_s5 + $0x28] sm:$0xff]  ;;  %v286_v36 = vld [vmem:[%s824_s5 + $0x30] sm:$0xff] }
   0xc   :  { %v588_v35 = vpack.c.bf16 %v285_v34, %v284_v33  ;;  %v287_v37 = vld [vmem:[%s824_s5 + $0x38] sm:$0xff]  ;;  %v418_v39 = vld [vmem:[%s821_s2] ss:$0 sm:$0xff] }
   0xd   :  { %543 = vmatpush3.bf16.xpose.msk.msra.mxu0 %vm685_vm1, %v538_v6  ;;  %v592_v38 = vpack.c.bf16 %v287_v37, %v286_v36  ;;  %v429_v52 = vld [vmem:[%s823_s4] ss:$0 sm:$0xff]  ;;  %s631_s4 = smov [#allocation2]  }
   0xe   :  { %546 = vmatprep.subr.msk.bf16.mxu0 %vm685_vm1, %v544_v16  ;;  %v444_v63 = vld [vmem:[%s825_s6] ss:$0 sm:$0xff]  ;;  %s407_s8 = sshll.u32 %s631_s4, 4  ;;  %s408_s8 = int_to_ptr.vmem [resolvable:$true] %s407_s8 }
   0xf   :  { %567 = vmatpush3.bf16.xpose.msk.msra.mxu1 %vm685_vm1, %v562_v13  ;;  %s607_s9 = scalar_lea.vmem %s408_s8, 256  ;;  %p612_p1 = scmp.lt.s32.totalorder %s408_s8, %s408_s8 }
  0x10   :  { %570 = vmatprep.subr.msk.bf16.mxu1 %vm685_vm1, %v568_v19  ;;  %p608_p0 = scmp.ne.s32.totalorder %s408_s8, %s607_s9  ;;  %p613_p2 = scmp.lt.s32.totalorder %s607_s9, %s607_s9 }
  0x12   :  { %p614_p3 = por %p613_p2, %p612_p1 }
  0x14   :  { %p615_p4 = pnand %p614_p3, %p608_p0 }
  0x15   :  { %549 = vmatpush3.bf16.xpose.msk.msra.mxu0 %vm685_vm1, %v544_v16 }
  0x16   :  { %552 = vmatprep.subr.msk.bf16.mxu0 %vm685_vm1, %v550_v22 }
  0x17   :  { %573 = vmatpush3.bf16.xpose.msk.msra.mxu1 %vm685_vm1, %v568_v19 }
  0x18   :  { %576 = vmatprep.subr.msk.bf16.mxu1 %vm685_vm1, %v574_v25 }
  0x1d   :  { %555 = vmatpush3.bf16.xpose.msk.msra.mxu0 %vm685_vm1, %v550_v22 }
  0x1e   :  { %581 = vmatprep.subr.bf16.mxu0 %v580_v29 }
  0x1f   :  { %579 = vmatpush3.bf16.xpose.msk.msra.mxu1 %vm685_vm1, %v574_v25 }
  0x24   :  { %492 = vmatmul.mubr.msk.f32.vlgmr.msra.gmra.mrb[0].mxu0 %vm45_vm0, %v30_v26 }
  0x25   :  { %583 = vmatpush3.bf16.msra.mxu0 %v580_v29 }
  0x26   :  { %511 = vmatmul.mubr.msk.f32.vlgmr.msra.gmra.mrb[0].mxu1 %vm45_vm0, %v30_v26  ;;  %585 = vmatprep.subr.bf16.mxu0 %v584_v32 }
  0x29   :  { %587 = vmatpush3.bf16.msra.mxu0 %v584_v32 }
  0x2a   :  { %589 = vmatprep.subr.bf16.mxu0 %v588_v35 }
  0x2d   :  { %591 = vmatpush3.bf16.msra.mxu0 %v588_v35 }
  0x2e   :  { %593 = vmatprep.subr.bf16.mxu0 %v592_v38 }
  0x31   :  { %595 = vmatpush3.bf16.msra.mxu0 %v592_v38 }
  0xf7   :  { %v493_v40 = vpop.f32.mrb[0].mxu0 }
  0xf8   :  { %v148_v41 = vadd.f32 %v493_v40, %v418_v39  ;;  %v142_v42 = vpop.f32.mrb[1].mxu0 }
  0xf9   :  { %v143_v43 = vadd.f32 %v418_v39, %v142_v42  ;;  %v512_v45 = vpop.f32.mrb[0].mxu1 }
  0xfa   :  { %v441_v44 = vmul.f32 -1.442695, %v148_v41  ;;  %v255_v47 = vpop.f32.mrb[1].mxu1  ;;  %v261_v53 = vadd.f32 %v512_v45, %v429_v52 }
  0xfb   :  { %v440_v46 = vmul.f32 -1.442695, %v143_v43  ;;  %v256_v55 = vadd.f32 %v429_v52, %v255_v47 }
  0xfc   :  { %599 = vpow2.f32 %v441_v44 }
  0xfd   :  { %601 = vpow2.f32 %v440_v46 }
 0x106   :  { %v600_v48 = vpop.eup %599 }
 0x107   :  { %v602_v49 = vpop.eup %601  ;;  %v271_v50 = vadd.f32 1.0, %v600_v48 }
 0x108   :  { %v270_v51 = vadd.f32 1.0, %v602_v49 }
 0x109   :  { %603 = vrcp.f32 %v271_v50 }
 0x10a   :  { %605 = vrcp.f32 %v270_v51 }
 0x113   :  { %v604_v54 = vpop.eup %603 }
 0x114   :  { %v606_v56 = vpop.eup %605  ;;  %v277_v57 = vmul.f32 %v604_v54, %v148_v41 }
 0x115   :  { %v276_v58 = vmul.f32 %v606_v56, %v143_v43 }
 0x116   :  { %v279_v59 = vmul.f32 %v277_v57, %v261_v53 }
 0x117   :  { %v278_v60 = vmul.f32 %v276_v58, %v256_v55 }
 0x119   :  { %529 = vmatprep.mubr.msk.f32.mxu0 %vm288_vm2, %v278_v60 }
 0x11a   :  { %530 = vmatmul.mubr.msk.f32.vlgmr.msra.gmra.mrb[2].mxu0 %vm288_vm2, %v279_v59 }
 0x1ed   :  { %v531_v61 = vpop.f32.mrb[2].mxu0 }
 0x1ee   :  { %375 = vst.msk [vmem:[#allocation2 + $0x8] sm:$0xff] %vm45_vm0, %v531_v61  ;;  %v361_v62 = vpop.f32.mrb[3].mxu0 }
 0x1ef   :  { %374 = vst.msk [vmem:[#allocation2] sm:$0xff] %vm45_vm0, %v361_v62 }
 0x1f5   :  { %v390_v0 = vld [vmem:[#allocation2 + $0x8] sm:$0xff] }
 0x1f6   :  { %v399_v1 = vadd.f32 %v444_v63, %v390_v0  ;;  %v389_v2 = vld [vmem:[#allocation2] sm:$0xff] }
 0x1f7   :  { %v398_v3 = vadd.f32 %v444_v63, %v389_v2 }
 0x1f8   :  { %401 = vst.msk [vmem:[#allocation2 + $0x8] sm:$0xff] %vm45_vm0, %v399_v1 }
 0x1f9   :  { %400 = vst.msk [vmem:[#allocation2] sm:$0xff] %vm45_vm0, %v398_v3 }
 0x1fa   :  { %618 = shalt.err (!%p615_p4)
}
 0x1fb   :  { %s619_s11 = scalar_lea.hbm %s826_s7, 256 }
 0x1fc   :  { %p620_p5 = scmp.ne.s32.totalorder %s826_s7, %s619_s11  ;;  %p623_p6 = scmp.lt.u32.totalorder %s619_s11, %s826_s7 }
 0x1fe   :  { %p625_p7 = pnand %p623_p6, %p620_p5 }
 0x200   :  { %628 = shalt.err (!%p625_p7)
}
 0x201   :  { %s632_s14 = smov 128   ;;  %s633_s15 = smov 8  }
 0x202   :  { %413 = dma.vmem_to_hbm [thread:$0]  %s408_s8, 256, %s826_s7, [#allocation3], %s632_s14, %s632_s14, %s633_s15  }
 0x203   :  { %629 = dma.done.wait [#allocation3], 256  }
 0x204   :  { %630 = vsyncadd [#allocation3], 4294967040 }
 0x205   :  { %417 = vsyncpa [#allocation3], 1 }

</bundles_post_ra>
